<compile_context>
chip_gen: v7x
topology: tpu7x:2x2x1
jax: 0.10.0
libtpu: 0.0.40
codegen_flags: <defaults>
</compile_context>

<pallas_src>
import numpy as np
import jax
import jax.numpy as jnp
from jax.experimental import pallas as pl
from jax.experimental.pallas import tpu as pltpu


# ----------------------------------------------------------------------------
# Init-time glue: deterministic mask_fan (mirrors compute_grid /
# compute_grid_inverse / morphology_close from the PyTorch module).
# ----------------------------------------------------------------------------
def _compute_grid(w, h, center_x, center_y, r1, r2, theta):
    angles = np.linspace(-theta, theta, w).astype(np.float32)
    radii = np.linspace(r1, r2, h).astype(np.float32)
    sin_a, cos_a = np.sin(angles), np.cos(angles)
    grid = np.zeros((h, w, 2), np.float32)
    for i, r in enumerate(radii):
        grid[i, :, 0] = center_x + r * sin_a
        grid[i, :, 1] = center_y + r * cos_a
    return grid


def _conv3x3_ones(x):
    H, W = x.shape
    p = np.pad(x, 1)
    out = np.zeros_like(x)
    for dy in range(3):
        for dx in range(3):
            out += p[dy:dy + H, dx:dx + W]
    return out


def _dilate(x):
    return (_conv3x3_ones(x) > 0).astype(np.float32)


def _erode(x):
    return 1.0 - (_conv3x3_ones(1.0 - x) > 0).astype(np.float32)


def _morphology_close(x):
    return _erode(_dilate(x))


def make_mask_fan(w, h, center_x, center_y, r1, r2, theta):
    grid = _compute_grid(w, h, center_x, center_y, r1, r2, theta)
    mask = np.zeros((h, w), np.float32)
    for j in range(h):
        for i in range(w):
            xi, yi = np.round(grid[j, i]).astype(np.int64)
            if 0 <= xi < w and 0 <= yi < h:
                mask[yi, xi] = 1.0
    # PyTorch buffer shape is (1, H, W)
    return _morphology_close(mask)[None, :, :]


# ----------------------------------------------------------------------------
# Pallas kernel: lane-dense broadcasted multiply  out = X * mask_fan
# ----------------------------------------------------------------------------
def mask_mul_kernel(x_ref, m_ref, o_ref):
    # x_ref: (tr, tc) tile; m_ref: (1, tc) mask block (broadcast over rows).
    # Pure VPU multiply, full-lane stores (tc is a multiple of 128 or full dim).
    o_ref[...] = x_ref[...] * m_ref[...]


# ----------------------------------------------------------------------------
# Tiling / VMEM budgeting
# ----------------------------------------------------------------------------
_LANE = 128
_SUBLANE_32BIT = 8
_TILE_VMEM_BUDGET = 40 * 1024 * 1024   # bytes for the 4 pipelined X/out buffers
_VMEM_LIMIT_BYTES = 48 * 1024 * 1024   # scoped cap: headroom under v7x 64 MiB
_SMALL_BYPASS_BYTES = 2 * 1024 * 1024  # below this, let XLA fuse the multiply


def _round_up(x, m):
    return ((x + m - 1) // m) * m


def _round_down(x, m):
    return (x // m) * m


def _sublane_granularity(dtype):
    # Sub-32-bit dtypes pack along sublanes: 8 rows/vreg f32, 16 bf16, 32 int8.
    itemsize = jnp.dtype(dtype).itemsize
    return _SUBLANE_32BIT * max(1, 4 // itemsize)


def _choose_tiles(rows, cols_p, dtype):
    itemsize = jnp.dtype(dtype).itemsize
    sub = _sublane_granularity(dtype)
    # Reserve ~1 MiB for the (sublane-padded) mask block + misc scratch.
    per_buf = max((_TILE_VMEM_BUDGET - (1 << 20)) // 4, sub * _LANE * itemsize)

    # Column tile: keep the full (padded) row when a single `sub`-row strip of
    # it fits the per-buffer budget; otherwise split columns (multiple of 128).
    if cols_p * sub * itemsize <= per_buf:
        tc = cols_p
    else:
        tc = _round_down(per_buf // (sub * itemsize), _LANE)
        tc = max(_LANE, min(tc, cols_p))

    # Row tile from the remaining budget (reaches the >=512-row roofline
    # regime whenever cols is small enough to allow it).
    tr = per_buf // (tc * itemsize)
    tr = max(sub, _round_down(tr, sub))
    if tr >= rows:
        tr = rows  # full-extent block dim is always legal

    # Keep >=2 grid programs when possible so v7x shards across both
    # TensorCores (no-op on single-TC v5e/v6e).
    if pl.cdiv(rows, tr) * pl.cdiv(cols_p, tc) == 1 and rows >= 2 * sub:
        tr = max(sub, _round_down(pl.cdiv(rows, 2), sub))

    return tr, tc


# ----------------------------------------------------------------------------
# Forward wrapper
# ----------------------------------------------------------------------------
def passthrough_forward(X, mask_fan, *, force_pallas=False):
    """MergedLinearLabel11PassThrough.forward: X * mask_fan (broadcast).

    X:        (B, C, H, W)
    mask_fan: (1, H, W) or (H, W)
    """
    B, C, H, W = X.shape
    rows, cols = B * C, H * W
    dtype = X.dtype
    itemsize = jnp.dtype(dtype).itemsize

    x2 = X.reshape(rows, cols)
    m2 = jnp.asarray(mask_fan).reshape(1, cols).astype(dtype)  # pre-cast: no in-kernel promotion

    total_bytes = (2 * rows * cols + cols) * itemsize
    if not force_pallas and total_bytes < _SMALL_BYPASS_BYTES:
        # Launch + DMA-setup overhead dominates at tiny sizes; a fused XLA
        # multiply is strictly faster here.
        return (x2 * m2).reshape(B, C, H, W)

    # Lane-dense layout: pad the flattened spatial axis to a multiple of 128
    # so output stores are full-width (unmasked) vst on every generation.
    cols_p = _round_up(cols, _LANE)
    if cols_p != cols:
        x2 = jnp.pad(x2, ((0, 0), (0, cols_p - cols)))
        m2 = jnp.pad(m2, ((0, 0), (0, cols_p - cols)))

    tr, tc = _choose_tiles(rows, cols_p, dtype)
    grid = (pl.cdiv(rows, tr), pl.cdiv(cols_p, tc))

    cost = pl.CostEstimate(
        flops=rows * cols, transcendentals=0, bytes_accessed=total_bytes)

    def build(mask_single_buffered):
        mask_kwargs = {}
        if mask_single_buffered and hasattr(pl, "Buffered"):
            # Constant row-index mask block: double-buffering it only wastes
            # sublane-padded VMEM (8x raw f32 / 16x bf16 per extra buffer).
            mask_kwargs["pipeline_mode"] = pl.Buffered(1)
        return pl.pallas_call(
            mask_mul_kernel,
            out_shape=jax.ShapeDtypeStruct((rows, cols_p), dtype),
            grid=grid,
            in_specs=[
                pl.BlockSpec((tr, tc), lambda i, j: (i, j)),
                pl.BlockSpec((1, tc), lambda i, j: (0, j), **mask_kwargs),
            ],
            out_specs=pl.BlockSpec((tr, tc), lambda i, j: (i, j)),
            compiler_params=pltpu.CompilerParams(
                dimension_semantics=("parallel", "parallel"),
                vmem_limit_bytes=_VMEM_LIMIT_BYTES),
            cost_estimate=cost,
        )

    try:
        out2 = build(mask_single_buffered=True)(x2, m2)
    except Exception:
        # Older jax without BlockSpec(pipeline_mode=...) support.
        out2 = build(mask_single_buffered=False)(x2, m2)

    if cols_p != cols:
        out2 = out2[:, :cols]
    return out2.reshape(B, C, H, W)


# ----------------------------------------------------------------------------
if __name__ == "__main__":
    # Small shapes consistent with the forward (NCHW image batch).
    B, C, H, W = 2, 4, 16, 16

    # TODO(synk): the checkpoint-loaded USR/G submodules and torchvision
    # transforms are unused by the PassThrough forward and are not translated.
    mask_fan_np = make_mask_fan(
        w=W, h=H, center_x=W / 2.0, center_y=0.0,
        r1=2.0, r2=float(H - 1), theta=np.pi / 4.0)
    mask_fan = jnp.asarray(mask_fan_np, dtype=jnp.float32)

    key = jax.random.PRNGKey(0)
    X = jax.random.normal(key, (B, C, H, W), dtype=jnp.float32)

    # force_pallas=True so the demo exercises the kernel despite the tiny size
    # (the production path would take the fused-XLA bypass here).
    out = jax.block_until_ready(passthrough_forward(X, mask_fan, force_pallas=True))

    # Reference semantics: (B,C,H,W) * (1,H,W) broadcast, as in PyTorch.
    ref = X * mask_fan
    np.testing.assert_allclose(np.asarray(out), np.asarray(ref), rtol=0, atol=0)

    print("KERNEL_OK")
</pallas_src>

<mosaic_0001>
module attributes {stable_mosaic.version = 11 : i64} {
  func.func @mask_mul_kernel(%arg0: i32, %arg1: i32, %arg2: memref<8x256xf32, #tpu.memory_space<vmem>>, %arg3: memref<1x256xf32, #tpu.memory_space<vmem>>, %arg4: memref<8x256xf32, #tpu.memory_space<vmem>>) attributes {dimension_semantics = [#tpu.dimension_semantics<parallel>, #tpu.dimension_semantics<parallel>], iteration_bounds = array<i64: 1, 1>, scalar_prefetch = 0 : i64, scratch_operands = 0 : i64, tpu.core_type = #tpu.core_type<tc>, window_params = [{transform_indices = @transform_0, window_bounds = array<i64: 8, 256>}, {pipeline_mode = #tpu.pipeline_mode<synchronous>, transform_indices = @transform_1, window_bounds = array<i64: 1, 256>}, {transform_indices = @transform_2, window_bounds = array<i64: 8, 256>}]} {
    %c0 = arith.constant 0 : index
    %c0_0 = arith.constant 0 : index
    %0 = vector.load %arg2[%c0, %c0_0] : memref<8x256xf32, #tpu.memory_space<vmem>>, vector<8x256xf32>
    %c0_1 = arith.constant 0 : index
    %c0_2 = arith.constant 0 : index
    %1 = vector.load %arg3[%c0_1, %c0_2] : memref<1x256xf32, #tpu.memory_space<vmem>>, vector<1x256xf32>
    %2 = vector.broadcast %1 : vector<1x256xf32> to vector<8x256xf32>
    %3 = arith.mulf %0, %2 : vector<8x256xf32>
    %c0_3 = arith.constant 0 : index
    %c0_4 = arith.constant 0 : index
    %4 = vector.load %arg4[%c0_3, %c0_4] : memref<8x256xf32, #tpu.memory_space<vmem>>, vector<8x256xf32>
    tpu.vector_store %arg4[%c0_3, %c0_4], %3 {strides = array<i32>} : memref<8x256xf32, #tpu.memory_space<vmem>>, vector<8x256xf32>,
    return
  }
  func.func @transform_0(%arg0: i32, %arg1: i32) -> (i32, i32) {
    %c0_i32 = arith.constant 0 : i32
    return %arg0, %arg1 : i32, i32
  }
  func.func @transform_1(%arg0: i32, %arg1: i32) -> (i32, i32) {
    %c0_i32 = arith.constant 0 : i32
    %c0_i32_0 = arith.constant 0 : i32
    return %c0_i32, %arg1 : i32, i32
  }
  func.func @transform_2(%arg0: i32, %arg1: i32) -> (i32, i32) {
    %c0_i32 = arith.constant 0 : i32
    return %arg0, %arg1 : i32, i32
  }
}

module attributes {stable_mosaic.version = 11 : i64} {
  func.func @mask_mul_kernel(%arg0: i32, %arg1: i32, %arg2: memref<8x256xf32, #tpu.memory_space<vmem>>, %arg3: memref<1x256xf32, #tpu.memory_space<vmem>>, %arg4: memref<8x256xf32, #tpu.memory_space<vmem>>) attributes {dimension_semantics = [#tpu.dimension_semantics<parallel>, #tpu.dimension_semantics<parallel>], iteration_bounds = array<i64: 1, 1>, scalar_prefetch = 0 : i64, scratch_operands = 0 : i64, tpu.core_type = #tpu.core_type<tc>, window_params = [{transform_indices = @transform_0, window_bounds = array<i64: 8, 256>}, {transform_indices = @transform_1, window_bounds = array<i64: 1, 256>}, {transform_indices = @transform_2, window_bounds = array<i64: 8, 256>}]} {
    %c0 = arith.constant 0 : index
    %c0_0 = arith.constant 0 : index
    %0 = vector.load %arg2[%c0, %c0_0] : memref<8x256xf32, #tpu.memory_space<vmem>>, vector<8x256xf32>
    %c0_1 = arith.constant 0 : index
    %c0_2 = arith.constant 0 : index
    %1 = vector.load %arg3[%c0_1, %c0_2] : memref<1x256xf32, #tpu.memory_space<vmem>>, vector<1x256xf32>
    %2 = vector.broadcast %1 : vector<1x256xf32> to vector<8x256xf32>
    %3 = arith.mulf %0, %2 : vector<8x256xf32>
    %c0_3 = arith.constant 0 : index
    %c0_4 = arith.constant 0 : index
    %4 = vector.load %arg4[%c0_3, %c0_4] : memref<8x256xf32, #tpu.memory_space<vmem>>, vector<8x256xf32>
    tpu.vector_store %arg4[%c0_3, %c0_4], %3 {strides = array<i32>} : memref<8x256xf32, #tpu.memory_space<vmem>>, vector<8x256xf32>,
    return
  }
  func.func @transform_0(%arg0: i32, %arg1: i32) -> (i32, i32) {
    %c0_i32 = arith.constant 0 : i32
    return %arg0, %arg1 : i32, i32
  }
  func.func @transform_1(%arg0: i32, %arg1: i32) -> (i32, i32) {
    %c0_i32 = arith.constant 0 : i32
    %c0_i32_0 = arith.constant 0 : i32
    return %c0_i32, %arg1 : i32, i32
  }
  func.func @transform_2(%arg0: i32, %arg1: i32) -> (i32, i32) {
    %c0_i32 = arith.constant 0 : i32
    return %arg0, %arg1 : i32, i32
  }
}

</mosaic_0001>

<bundles_post_ra>
// kernel: tpu_custom_call.1
= control target key start
LH: loop header
LB: loop body
LE: loop exit
PB: predicated region body
PF: predicated region fallthrough
CT: control target
= control target key end

     0   :  { %7 = vsyncpa [#allocation3], 0  ;;  %s151_s0 = inlined_call_operand.hbm [shape: f32[8,256], index: 0, kind: input, shape index: {}]   ;;  %s152_s1 = inlined_call_operand.vmem [shape: f32[1,256], index: 1, kind: input, shape index: {}]   ;;  %s153_s2 = inlined_call_operand.hbm [shape: f32[8,256], index: 2, kind: output, shape index: {}]  }
   0x1   :  { %8 = vsyncpa [#allocation4], 0  ;;  %s107_s9 = smov [#allocation2]   ;;  %s59_s13 = scalar_lea.hbm %s151_s0, 256 }
   0x2   :  { %s15_s10 = sshll.u32 %s107_s9, 4  ;;  %p60_p0 = scmp.ne.s32.totalorder %s151_s0, %s59_s13  ;;  %s16_s10 = int_to_ptr.vmem [resolvable:$true] %s15_s10 }
   0x3   :  { %p63_p1 = scmp.lt.u32.totalorder %s59_s13, %s151_s0 }
   0x5   :  { %p65_p2 = pnand %p63_p1, %p60_p0 }
   0x7   :  { %68 = shalt.err (!%p65_p2)
}
   0x8   :  { %s69_s18 = scalar_lea.vmem %s16_s10, 256  ;;  %p74_p4 = scmp.lt.s32.totalorder %s16_s10, %s16_s10 }
   0x9   :  { %p70_p3 = scmp.ne.s32.totalorder %s16_s10, %s69_s18  ;;  %p75_p5 = scmp.lt.s32.totalorder %s69_s18, %s69_s18 }
   0xb   :  { %p76_p6 = por %p75_p5, %p74_p4 }
   0xd   :  { %p77_p7 = pnand %p76_p6, %p70_p3 }
   0xf   :  { %80 = shalt.err (!%p77_p7)
}
  0x10   :  { %18 = dma.hbm_to_vmem [thread:$0]  %s151_s0, 256, %s16_s10, [#allocation3]  }
  0x11   :  { %103 = dma.done.wait [#allocation3], 256  }
  0x12   :  { %104 = vsyncadd [#allocation3], 4294967040  ;;  %v28_v0 = vlaneseq  ;;  %v24_v4 = vld [vmem:[#allocation2] sm:$0xff]  ;;  %v25_v6 = vld [vmem:[#allocation2 + $0x8] sm:$0xff]  ;;  %s108_s23 = smov [#allocation5]  }
  0x13   :  { %v26_v5 = vld [vmem:[%s152_s1] sm:$0x3]  ;;  %s48_s24 = sshll.u32 %s108_s23, 4  ;;  %s49_s24 = int_to_ptr.vmem [resolvable:$true] %s48_s24 }
  0x14   :  { %v29_v1 = vshrl.u32 %v28_v0, 7  ;;  %s81_s0 = scalar_lea.vmem %s49_s24, 256  ;;  %p86_p9 = scmp.lt.s32.totalorder %s49_s24, %s49_s24 }
  0x15   :  { %p82_p8 = scmp.ne.s32.totalorder %s49_s24, %s81_s0  ;;  %p87_p10 = scmp.lt.s32.totalorder %s81_s0, %s81_s0 }
  0x16   :  { %v30_v2 = vsub.s32 0, %v29_v1  ;;  %v34_v3 = vsub.s32 1, %v29_v1 }
  0x17   :  { %p88_p11 = por %p87_p10, %p86_p9 }
  0x18   :  { %v31_v7 = vrot.slane %v26_v5, %v30_v2  ;;  %v35_v8 = vrot.slane %v26_v5, %v34_v3 }
  0x19   :  { %p89_p12 = pnand %p88_p11, %p82_p8 }
  0x1a   :  { %v38_v9 = vmul.f32 %v31_v7, %v24_v4  ;;  %v39_v10 = vmul.f32 %v35_v8, %v25_v6 }
  0x1c   :  { %40 = vst [vmem:[#allocation5] sm:$0xff] %v38_v9  ;;  %41 = vst [vmem:[#allocation5 + $0x8] sm:$0xff] %v39_v10 }
  0x1d   :  { %92 = shalt.err (!%p89_p12)
}
  0x1e   :  { %s93_s1 = scalar_lea.hbm %s153_s2, 256 }
  0x1f   :  { %p94_p13 = scmp.ne.s32.totalorder %s153_s2, %s93_s1  ;;  %p97_p0 = scmp.lt.u32.totalorder %s93_s1, %s153_s2 }
  0x21   :  { %p99_p1 = pnand %p97_p0, %p94_p13 }
  0x23   :  { %102 = shalt.err (!%p99_p1)
}
  0x24   :  { %51 = dma.vmem_to_hbm [thread:$0]  %s49_s24, 256, %s153_s2, [#allocation4]  }
  0x25   :  { %105 = dma.done.wait [#allocation4], 256  }
  0x26   :  { %106 = vsyncadd [#allocation4], 4294967040 }
  0x27   :  { %55 = vsyncpa [#allocation3], 1 }
  0x28   :  { %56 = vsyncpa [#allocation4], 1 }

// kernel: tpu_custom_call.1
= control target key start
LH: loop header
LB: loop body
LE: loop exit
PB: predicated region body
PF: predicated region fallthrough
CT: control target
= control target key end

     0   :  { %7 = vsyncpa [#allocation3], 0  ;;  %s151_s0 = inlined_call_operand.hbm [shape: f32[8,256], index: 0, kind: input, shape index: {}]   ;;  %s152_s1 = inlined_call_operand.vmem [shape: f32[1,256], index: 1, kind: input, shape index: {}]   ;;  %s153_s2 = inlined_call_operand.hbm [shape: f32[8,256], index: 2, kind: output, shape index: {}]  }
   0x1   :  { %8 = vsyncpa [#allocation4], 0  ;;  %s107_s9 = smov [#allocation2]   ;;  %s59_s13 = scalar_lea.hbm %s151_s0, 256 }
   0x2   :  { %s15_s10 = sshll.u32 %s107_s9, 4  ;;  %p60_p0 = scmp.ne.s32.totalorder %s151_s0, %s59_s13  ;;  %s16_s10 = int_to_ptr.vmem [resolvable:$true] %s15_s10 }
   0x3   :  { %p63_p1 = scmp.lt.u32.totalorder %s59_s13, %s151_s0 }
   0x5   :  { %p65_p2 = pnand %p63_p1, %p60_p0 }
   0x7   :  { %68 = shalt.err (!%p65_p2)
}
   0x8   :  { %s69_s18 = scalar_lea.vmem %s16_s10, 256  ;;  %p74_p4 = scmp.lt.s32.totalorder %s16_s10, %s16_s10 }
   0x9   :  { %p70_p3 = scmp.ne.s32.totalorder %s16_s10, %s69_s18  ;;  %p75_p5 = scmp.lt.s32.totalorder %s69_s18, %s69_s18 }
   0xb   :  { %p76_p6 = por %p75_p5, %p74_p4 }
   0xd   :  { %p77_p7 = pnand %p76_p6, %p70_p3 }
   0xf   :  { %80 = shalt.err (!%p77_p7)
}
  0x10   :  { %18 = dma.hbm_to_vmem [thread:$0]  %s151_s0, 256, %s16_s10, [#allocation3]  }
  0x11   :  { %103 = dma.done.wait [#allocation3], 256  }
  0x12   :  { %104 = vsyncadd [#allocation3], 4294967040  ;;  %v28_v0 = vlaneseq  ;;  %v24_v4 = vld [vmem:[#allocation2] sm:$0xff]  ;;  %v25_v6 = vld [vmem:[#allocation2 + $0x8] sm:$0xff]  ;;  %s108_s23 = smov [#allocation5]  }
  0x13   :  { %v26_v5 = vld [vmem:[%s152_s1] sm:$0x3]  ;;  %s48_s24 = sshll.u32 %s108_s23, 4  ;;  %s49_s24 = int_to_ptr.vmem [resolvable:$true] %s48_s24 }
  0x14   :  { %v29_v1 = vshrl.u32 %v28_v0, 7  ;;  %s81_s0 = scalar_lea.vmem %s49_s24, 256  ;;  %p86_p9 = scmp.lt.s32.totalorder %s49_s24, %s49_s24 }
  0x15   :  { %p82_p8 = scmp.ne.s32.totalorder %s49_s24, %s81_s0  ;;  %p87_p10 = scmp.lt.s32.totalorder %s81_s0, %s81_s0 }
  0x16   :  { %v30_v2 = vsub.s32 0, %v29_v1  ;;  %v34_v3 = vsub.s32 1, %v29_v1 }
  0x17   :  { %p88_p11 = por %p87_p10, %p86_p9 }
  0x18   :  { %v31_v7 = vrot.slane %v26_v5, %v30_v2  ;;  %v35_v8 = vrot.slane %v26_v5, %v34_v3 }
  0x19   :  { %p89_p12 = pnand %p88_p11, %p82_p8 }
  0x1a   :  { %v38_v9 = vmul.f32 %v31_v7, %v24_v4  ;;  %v39_v10 = vmul.f32 %v35_v8, %v25_v6 }
  0x1c   :  { %40 = vst [vmem:[#allocation5] sm:$0xff] %v38_v9  ;;  %41 = vst [vmem:[#allocation5 + $0x8] sm:$0xff] %v39_v10 }
  0x1d   :  { %92 = shalt.err (!%p89_p12)
}
  0x1e   :  { %s93_s1 = scalar_lea.hbm %s153_s2, 256 }
  0x1f   :  { %p94_p13 = scmp.ne.s32.totalorder %s153_s2, %s93_s1  ;;  %p97_p0 = scmp.lt.u32.totalorder %s93_s1, %s153_s2 }
  0x21   :  { %p99_p1 = pnand %p97_p0, %p94_p13 }
  0x23   :  { %102 = shalt.err (!%p99_p1)
}
  0x24   :  { %51 = dma.vmem_to_hbm [thread:$0]  %s49_s24, 256, %s153_s2, [#allocation4]  }
  0x25   :  { %105 = dma.done.wait [#allocation4], 256  }
  0x26   :  { %106 = vsyncadd [#allocation4], 4294967040 }
  0x27   :  { %55 = vsyncpa [#allocation3], 1 }
  0x28   :  { %56 = vsyncpa [#allocation4], 1 }

</bundles_post_ra>
